<compile_context>
chip_gen: v5e
topology: v5e:2x2
jax: 0.10.0
libtpu: 0.0.40
codegen_flags: <defaults>
</compile_context>

<pallas_src>
import jax
import jax.numpy as jnp
from jax.experimental import pallas as pl
from jax.experimental.pallas import tpu as pltpu

# SMOOTHING_TERM is an (unshown) module-level constant in the reference code.
SMOOTHING_TERM = 1e-5

_LANE = 128
_SUBLANE = 8


def _sbn_kernel(x_ref, o_ref):
    # x_ref: [B, TILE_D] block (full batch, a slice of features). Cast once per tile;
    # all statistics math stays on the f32 VALU path (no low-precision intermediates).
    x = x_ref[...].astype(jnp.float32)

    mu = jnp.mean(x, axis=0, keepdims=True)            # [1, TILE_D] (reduce over batch)
    xc = x - mu                                        # computed once, reused twice
    var = jnp.mean(xc * xc, axis=0, keepdims=True)     # population variance
    sigma = jnp.sqrt(var)                              # std, correction=0

    # One exact reciprocal on the [1, TILE_D] row (not a per-element divide over BxD).
    # NOTE: eps is added to sigma (matches reference), NOT to var.
    inv = 1.0 / (sigma + SMOOTHING_TERM)

    o_ref[...] = (xc * inv).astype(o_ref.dtype)


def _round_up(v, m):
    return -(-v // m) * m


def _pick_tile(B, D, itemsize, *, target_block_bytes, vmem_budget_bytes):
    """Batch-aware feature-tile size (multiple of 128)."""
    d128 = _round_up(D, _LANE)
    b_sub = _round_up(B, _SUBLANE)  # sublane-padded rows actually occupied in VMEM

    # Cap from the HBM-traffic target: each grid step reads+writes ~B*td*itemsize.
    td_hbm = max(target_block_bytes // max(B * itemsize, 1), _LANE)
    # Cap from the VMEM budget: ~6 live block-equivalents (2x in, 2x out, f32 temps),
    # counted with the sublane-padded row count and f32 temporaries.
    td_vmem = max(vmem_budget_bytes // (6 * b_sub * 4), _LANE)

    td = min(td_hbm, td_vmem, d128)
    # Keep >= 2 feature tiles whenever possible so v7x's two TensorCores both run.
    if d128 > _LANE:
        td = min(td, _round_up(d128 // 2, _LANE))
    td = max((td // _LANE) * _LANE, _LANE)
    return td


def spatial_batch_norm(x, *, target_block_bytes=4 << 20, vmem_budget_bytes=32 << 20):
    """x: [B, C, H, W]. Returns normalized tensor of the same shape/dtype."""
    B, C, H, W = x.shape
    D = C * H * W
    x2 = x.reshape(B, D)  # contiguous -> free view, no extra HBM pass
    itemsize = jnp.dtype(x.dtype).itemsize

    td = _pick_tile(
        B, D, itemsize,
        target_block_bytes=target_block_bytes,
        vmem_budget_bytes=vmem_budget_bytes,
    )
    grid = (pl.cdiv(D, td),)  # ragged last block handled by Pallas masking

    out = pl.pallas_call(
        _sbn_kernel,
        out_shape=jax.ShapeDtypeStruct((B, D), x.dtype),
        grid_spec=pltpu.PrefetchScalarGridSpec(
            num_scalar_prefetch=0,
            grid=grid,
            # Only the feature axis is tiled; the batch (reduction) axis stays whole
            # in every block, so mu/var need no cross-tile accumulation.
            in_specs=[pl.BlockSpec((B, td), lambda j: (0, j))],
            out_specs=pl.BlockSpec((B, td), lambda j: (0, j)),
        ),
        compiler_params=pltpu.CompilerParams(
            # Feature tiles are independent -> shard across both TCs on v7x.
            dimension_semantics=("parallel",),
            # Above the 16/32 MiB scoped defaults (v5e/v6e) so the enlarged tiles are
            # accepted, but within v7x's 64 MiB physical VMEM.
            vmem_limit_bytes=48 << 20,
        ),
        cost_estimate=pl.CostEstimate(
            flops=5 * B * D,
            transcendentals=D,
            bytes_accessed=2 * B * D * itemsize,
        ),
    )(x2)

    return out.reshape(B, C, H, W)


def spatial_batch_norm_ref(x):
    """Pure-JAX reference matching the PyTorch module."""
    mu = jnp.mean(x, axis=0, keepdims=True)                    # [1, C, H, W]
    sigma = jnp.sqrt(jnp.mean((x - mu) ** 2, axis=0, keepdims=True))
    return (x - mu) / (sigma + SMOOTHING_TERM)


if __name__ == "__main__":
    B, C, H, W = 2, 4, 16, 16  # D = C*H*W = 1024 (lane-dense, 2 feature tiles)

    key = jax.random.PRNGKey(0)
    x = jax.random.normal(key, (B, C, H, W), dtype=jnp.float32)

    out = spatial_batch_norm(x)
    out = jax.block_until_ready(out)

    ref = spatial_batch_norm_ref(x)
    assert out.shape == x.shape
    assert jnp.allclose(out, ref, atol=1e-5, rtol=1e-5), "SpatialBatchNormalization mismatch"

    # Non-multiple-of-128 feature count: exercises the ragged (masked) last block,
    # which replaces the old host-side pad + slice copies.
    x_small = jax.random.normal(jax.random.PRNGKey(1), (4, 3, 5, 7), dtype=jnp.float32)
    out_small = jax.block_until_ready(spatial_batch_norm(x_small))
    ref_small = spatial_batch_norm_ref(x_small)
    assert out_small.shape == x_small.shape
    assert jnp.allclose(out_small, ref_small, atol=1e-5, rtol=1e-5), "ragged-path mismatch"

    print("KERNEL_OK")
</pallas_src>

<mosaic_0001>
module attributes {stable_mosaic.version = 11 : i64} {
  func.func @_sbn_kernel(%arg0: i32, %arg1: memref<2x512xf32, #tpu.memory_space<vmem>>, %arg2: memref<2x512xf32, #tpu.memory_space<vmem>>) attributes {dimension_semantics = [#tpu.dimension_semantics<parallel>], iteration_bounds = array<i64: 2>, scalar_prefetch = 0 : i64, scratch_operands = 0 : i64, tpu.core_type = #tpu.core_type<tc>, window_params = [{transform_indices = @transform_0, window_bounds = array<i64: 2, 512>}, {transform_indices = @transform_1, window_bounds = array<i64: 2, 512>}]} {
    %c0 = arith.constant 0 : index
    %c0_0 = arith.constant 0 : index
    %0 = vector.load %arg1[%c0, %c0_0] : memref<2x512xf32, #tpu.memory_space<vmem>>, vector<2x512xf32>
    %cst = arith.constant dense<0.000000e+00> : vector<512xf32>
    %1 = vector.multi_reduction <add>, %0, %cst [0] : vector<2x512xf32> to vector<512xf32>
    %2 = vector.shape_cast %1 : vector<512xf32> to vector<1x512xf32>
    %cst_1 = arith.constant 2.000000e+00 : f32
    %3 = vector.broadcast %cst_1 : f32 to vector<1x512xf32>
    %4 = arith.divf %2, %3 : vector<1x512xf32>
    %5 = vector.broadcast %4 : vector<1x512xf32> to vector<2x512xf32>
    %6 = arith.subf %0, %5 : vector<2x512xf32>
    %7 = arith.mulf %6, %6 : vector<2x512xf32>
    %cst_2 = arith.constant dense<0.000000e+00> : vector<512xf32>
    %8 = vector.multi_reduction <add>, %7, %cst_2 [0] : vector<2x512xf32> to vector<512xf32>
    %9 = vector.shape_cast %8 : vector<512xf32> to vector<1x512xf32>
    %cst_3 = arith.constant 2.000000e+00 : f32
    %10 = vector.broadcast %cst_3 : f32 to vector<1x512xf32>
    %11 = arith.divf %9, %10 : vector<1x512xf32>
    %12 = math.sqrt %11 : vector<1x512xf32>
    %cst_4 = arith.constant 9.99999974E-6 : f32
    %13 = vector.broadcast %cst_4 : f32 to vector<1x512xf32>
    %14 = arith.addf %12, %13 : vector<1x512xf32>
    %cst_5 = arith.constant 1.000000e+00 : f32
    %15 = vector.broadcast %cst_5 : f32 to vector<1x512xf32>
    %16 = arith.divf %15, %14 : vector<1x512xf32>
    %17 = vector.broadcast %16 : vector<1x512xf32> to vector<2x512xf32>
    %18 = arith.mulf %6, %17 : vector<2x512xf32>
    %c0_6 = arith.constant 0 : index
    %c0_7 = arith.constant 0 : index
    %19 = vector.load %arg2[%c0_6, %c0_7] : memref<2x512xf32, #tpu.memory_space<vmem>>, vector<2x512xf32>
    tpu.vector_store %arg2[%c0_6, %c0_7], %18 {strides = array<i32>} : memref<2x512xf32, #tpu.memory_space<vmem>>, vector<2x512xf32>,
    return
  }
  func.func @transform_0(%arg0: i32) -> (i32, i32) {
    %c0_i32 = arith.constant 0 : i32
    %c0_i32_0 = arith.constant 0 : i32
    return %c0_i32, %arg0 : i32, i32
  }
  func.func @transform_1(%arg0: i32) -> (i32, i32) {
    %c0_i32 = arith.constant 0 : i32
    %c0_i32_0 = arith.constant 0 : i32
    return %c0_i32, %arg0 : i32, i32
  }
}

</mosaic_0001>

<bundles_post_ra>
// kernel: tpu_custom_call.1
= control target key start
LH: loop header
LB: loop body
LE: loop exit
PB: predicated region body
PF: predicated region fallthrough
CT: control target
= control target key end

     0   :  { %6 = vsyncpa [#allocation3], 0  ;;  %s815_s0 = inlined_call_operand.hbm [shape: f32[2,1024], index: 0, kind: input, shape index: {}]   ;;  %s816_s1 = inlined_call_operand.hbm [shape: f32[2,1024], index: 1, kind: output, shape index: {}]  }
   0x1   :  { %8 = vsyncpa [#allocation3 + $0x1], 0 }
   0x2   :  { %9 = vsyncpa [#allocation4], 0 }
   0x3   :  { %11 = vsyncpa [#allocation4 + $0x1], 0  ;;  %s647_s6 = smov 0   ;;  %s649_s7 = smov 0  }
   0x4   :  { %s651_s8 = smov 0   ;;  %s653_s9 = smov 0  }
   0x5 LB: > { %s668_s10 = sadd.s32 4294967295, %s634_s9   ;;  %s457_s11 = sadd.s32 4294967294, %s634_s9   ;;  %s634_s9 = sphi %s653_s9, %s828_s9   ;;  %s630_s8 = sphi %s651_s8, %s827_s8   ;;  %s626_s7 = sphi %s649_s7, %s826_s7   ;;  %s622_s6 = sphi %s647_s6, %s825_s6  }
   0x6   : > { %s672_s12 = sadd.s32 1, %s634_s9   ;;  %s24_s13 = sadd.s32 1, %s630_s8 }
   0x7   : > { %s21_s14 = ssub.s32 %s634_s9, %s672_s12  ;;  %p31_p0 = scmp.ne.s32.totalorder %s630_s8, %s626_s7 }
   0x8   : > { %p22_p1 = scmp.eq.s32.totalorder %s21_s14, 0  ;;  %p32_p2 = scmp.eq.s32.totalorder %s634_s9, 0 }
   0x9   : > { %p37_p3 = scmp.ne.s32.totalorder %s626_s7, %s622_s6  ;;  %p38_p4 = scmp.eq.s32.totalorder %s668_s10, 0 }
   0xa   : > { %s684_s15 = scalar_select %p22_p1, %s630_s8, %s24_s13  }
   0xb   : > { %p686_p5 = por %p32_p2, %p31_p0  ;;  %p690_p6 = por %p38_p4, %p37_p3 }
   0xc   : > { %p61_p7 = scmp.eq.s32.totalorder %s668_s10, 1  ;;  %p67_p8 = scmp.eq.s32.totalorder %s457_s11, 1 }
   0xd   : > { %p485_p10 = scmp.lt.s32.totalorder %s634_s9, 2  ;;  %s87_s20 = sand.u32 1, %s630_s8  }
   0xe   : > { %p697_p11 = por %p61_p7, %p31_p0  ;;  %p701_p12 = por %p67_p8, %p37_p3 }
   0xf   : > { %s471_s21 = sshll.u32 %s634_s9, 3  ;;  %s460_s22 = sshll.u32 %s87_s20, 3 }
  0x10   : > { %s96_s25 = scalar_lea.hbm %s815_s0, %s471_s21  ;;  %s91_s27 = scalar_lea.vmem [#allocation2], %s460_s22 }
  0x11   : > { %s98_s26 = sshll.u32 %s96_s25, 4  ;;  %s100_s28 = sshll.u32 %s91_s27, 4  ;;  %s99_s26 = int_to_ptr.hbm [resolvable:$true] %s98_s26  ;;  %s101_s28 = int_to_ptr.vmem [resolvable:$true] %s100_s28 }
  0x12   : > { %p712_p13 = pnand %p485_p10, %p686_p5  ;;  %p463_p0 = scmp.ge.s32.totalorder %s634_s9, 1 }
  0x13   : > { %p105_p1 = scmp.lt.s32.totalorder %s634_s9, 3  ;;  %s88_s30 = scalar_lea.sflag [#allocation3], %s87_s20 }
  0x14   : > { %s538_s2 = sshra.s32 %s99_s26, 4  ;;  %p542_p3 = pneg %p712_p13  ;;  %s539_s2 = int_to_ptr.hbm [resolvable:$true] %s538_s2 }
  0x15   : > { %s540_s3 = scalar_lea.hbm %s539_s2, 8  ;;  %s545_s11 = scalar_lea.hbm %s815_s0, 16 }
  0x16   : > { %p541_p2 = scmp.ne.s32.totalorder %s539_s2, %s540_s3  ;;  %p546_p5 = scmp.lt.s32.totalorder %s539_s2, %s815_s0 }
  0x17   : > { %p547_p8 = scmp.lt.s32.totalorder %s545_s11, %s540_s3 }
  0x18   : > { %p543_p4 = pnand %p542_p3, %p541_p2 }
  0x19   : > { %p548_p10 = por %p547_p8, %p546_p5 }
  0x1a   : > { %p544_p7 = pneg %p543_p4 }
  0x1c   : > { %p549_p9 = pnand %p548_p10, %p544_p7 }
  0x1e   : > { %552 = shalt.err (!%p549_p9)
}
  0x1f   : > { %480 = dma.hbm_to_vmem [thread:$0]  (!%p712_p13), %s99_s26, 128, %s101_s28, %s88_s30  }
  0x20   : > { %p106_p2 = pnand %p463_p0, %p105_p1 }
  0x21   : > { %s733_s16 = sand.u32 (!%p106_p2), 1, %s626_s7  }
  0x22   : > { %109 = sbr.rel (%p106_p2) target bundleno = 150 (0x96), region = 24  ;;  %s464_s20 = sshll.u32 (!%p106_p2), %s733_s16, 3 }
  0x23   : > { %s112_s21 = scalar_lea.sflag (!%p106_p2), [#allocation3], %s733_s16  ;;  %s115_s22 = scalar_lea.vmem (!%p106_p2), [#allocation2], %s464_s20 }
  0x27   : > { %613 = dma.done.wait (%p690_p6), %s112_s21, 128  }
  0x28   : > { %615 = vsyncadd (%p690_p6), %s112_s21, 4294967168  ;;  %v636_v0 = vmov 2.0   ;;  %v137_v2 = vld [vmem:[%s115_s22] sm:$0xff]  ;;  %vm148_vm0 = vcmask 1041408   ;;  %vm196_vm2 = vcmask 1045508   ;;  %vm198_vm3 = vcmask 1043456  }
  0x29   : > { %520 = vrcp.f32 %v636_v0  ;;  %139 = vst [vmem:[#allocation1] ss:$4 sm:$0xff] %v137_v2  ;;  %s472_s17 = sshll.u32 %s668_s10, 3  ;;  %s134_s25 = scalar_lea.vmem [#allocation5], %s464_s20 }
  0x2a   : > { %s382_s10 = scalar_lea.hbm %s816_s1, %s472_s17  ;;  %s384_s26 = sshll.u32 %s134_s25, 4  ;;  %s385_s26 = int_to_ptr.vmem [resolvable:$true] %s384_s26 }
  0x2b   : > { %s386_s27 = sshll.u32 %s382_s10, 4  ;;  %s371_s28 = scalar_lea.sflag [#allocation4], %s733_s16  ;;  %s387_s27 = int_to_ptr.hbm [resolvable:$true] %s386_s27 }
  0x2c   : > { %s582_s29 = sshra.s32 %s387_s27, 4  ;;  %s588_s4 = scalar_lea.hbm %s816_s1, 16  ;;  %s583_s29 = int_to_ptr.hbm [resolvable:$true] %s582_s29 }
  0x2d   : > { %s584_s30 = scalar_lea.hbm %s583_s29, 8  ;;  %p589_p0 = scmp.lt.s32.totalorder %s583_s29, %s816_s1 }
  0x2e   : > { %p585_p6 = scmp.ne.s32.totalorder %s583_s29, %s584_s30  ;;  %p590_p1 = scmp.lt.s32.totalorder %s588_s4, %s584_s30 }
  0x2f   : > { %v521_v1 = vpop.eup %520 }
  0x30   : > { %v178_v3 = vmul.f32 2.0, %v521_v1  ;;  %v140_v5 = vld.sshfl [vmem:[#allocation1] sm:$0xff pattern:$0x73625140]  ;;  %vm182_vm1 = vweird.f32 %v521_v1  ;;  %p586_p9 = pnand %p585_p6, %p697_p11  ;;  %p591_p3 = por %p590_p1, %p589_p0 }
  0x31   : > { %v141_v6 = vld.sshfl [vmem:[#allocation1 + $0x8] sm:$0xff pattern:$0x73625140]  ;;  %v142_v7 = vld.sshfl [vmem:[#allocation1 + $0x10] sm:$0xff pattern:$0x73625140] }
  0x32   : > { %v179_v4 = vsub.f32 1.0, %v178_v3  ;;  %v143_v8 = vld.sshfl [vmem:[#allocation1 + $0x18] sm:$0xff pattern:$0x73625140]  ;;  %v149_v9 = vsel %vm148_vm0, %v140_v5, 0.0  ;;  %v156_v10 = vsel %vm148_vm0, %v141_v6, 0.0  ;;  %p587_p13 = pneg %p586_p9 }
  0x33   : > { %v163_v11 = vsel %vm148_vm0, %v142_v7, 0.0  ;;  %v170_v12 = vsel %vm148_vm0, %v143_v8, 0.0  ;;  %v150_v13 = vrot.slane %v149_v9, 4  ;;  %v157_v14 = vrot.slane %v156_v10, 4 }
  0x34   : > { %v164_v15 = vrot.slane %v163_v11, 4  ;;  %v171_v16 = vrot.slane %v170_v12, 4  ;;  %v180_v17 = vmul.f32 %v521_v1, %v179_v4  ;;  %p592_p4 = pnand %p591_p3, %p587_p13 }
  0x35   : > { %v151_v18 = vadd.f32 %v150_v13, %v149_v9  ;;  %v158_v19 = vadd.f32 %v157_v14, %v156_v10 }
  0x36   : > { %v165_v20 = vadd.f32 %v164_v15, %v163_v11  ;;  %v172_v21 = vadd.f32 %v171_v16, %v170_v12  ;;  %v181_v26 = vadd.f32 %v521_v1, %v180_v17 }
  0x37   : > { %v152_v22 = vrot.slane %v151_v18, 2  ;;  %v159_v23 = vrot.slane %v158_v19, 2 }
  0x38   : > { %v166_v24 = vrot.slane %v165_v20, 2  ;;  %v173_v25 = vrot.slane %v172_v21, 2  ;;  %v183_v35 = vsel %vm182_vm1, %v521_v1, %v181_v26 }
  0x39   : > { %v153_v27 = vadd.f32 %v152_v22, %v151_v18  ;;  %v160_v28 = vadd.f32 %v159_v23, %v158_v19 }
  0x3a   : > { %v167_v29 = vadd.f32 %v166_v24, %v165_v20  ;;  %v174_v30 = vadd.f32 %v173_v25, %v172_v21 }
  0x3b   : > { %v154_v31 = vrot.slane %v153_v27, 1  ;;  %v161_v32 = vrot.slane %v160_v28, 1 }
  0x3c   : > { %v168_v33 = vrot.slane %v167_v29, 1  ;;  %v175_v34 = vrot.slane %v174_v30, 1 }
  0x3d   : > { %v155_v36 = vadd.f32 %v154_v31, %v153_v27  ;;  %v162_v37 = vadd.f32 %v161_v32, %v160_v28 }
  0x3e   : > { %v169_v38 = vadd.f32 %v168_v33, %v167_v29  ;;  %v176_v39 = vadd.f32 %v175_v34, %v174_v30 }
  0x3f   : > { %v185_v40 = vmul.f32 %v183_v35, %v162_v37  ;;  %v184_v43 = vmul.f32 %v183_v35, %v155_v36 }
  0x40   : > { %v186_v41 = vmul.f32 %v183_v35, %v169_v38  ;;  %v187_v42 = vmul.f32 %v183_v35, %v176_v39 }
  0x41   : > { %v192_v44 = vrot.slane %v185_v40, 6 }
  0x42   : > { %v193_v45 = vrot.slane %v186_v41, 4  ;;  %v194_v46 = vrot.slane %v187_v42, 2 }
  0x43   : > { %v195_v47 = vsel %vm148_vm0, %v184_v43, %v192_v44 }
  0x44   : > { %v197_v48 = vsel %vm196_vm2, %v193_v45, %v194_v46 }
  0x45   : > { %v199_v49 = vsel %vm198_vm3, %v195_v47, %v197_v48 }
  0x46   : > { %v750_v50 = vsub.f32 %v137_v2, %v199_v49 }
  0x48   : > { %v202_v51 = vmul.f32 %v750_v50, %v750_v50 }
  0x4a   : > { %204 = vst [vmem:[#allocation1] ss:$4 sm:$0xff] %v202_v51 }
  0x51   : > { %v205_v52 = vld.sshfl [vmem:[#allocation1] sm:$0xff pattern:$0x73625140]  ;;  %v206_v53 = vld.sshfl [vmem:[#allocation1 + $0x8] sm:$0xff pattern:$0x73625140] }
  0x52   : > { %v207_v54 = vld.sshfl [vmem:[#allocation1 + $0x10] sm:$0xff pattern:$0x73625140]  ;;  %v208_v55 = vld.sshfl [vmem:[#allocation1 + $0x18] sm:$0xff pattern:$0x73625140] }
  0x53   : > { %v213_v56 = vsel %vm148_vm0, %v205_v52, 0.0  ;;  %v220_v57 = vsel %vm148_vm0, %v206_v53, 0.0  ;;  %v227_v58 = vsel %vm148_vm0, %v207_v54, 0.0  ;;  %v234_v59 = vsel %vm148_vm0, %v208_v55, 0.0 }
  0x54   : > { %v214_v60 = vrot.slane %v213_v56, 4  ;;  %v221_v61 = vrot.slane %v220_v57, 4  ;;  %v228_v62 = vrot.slane %v227_v58, 4  ;;  %v235_v63 = vrot.slane %v234_v59, 4 }
  0x56   : > { %v215_v0 = vadd.f32 %v214_v60, %v213_v56  ;;  %v222_v1 = vadd.f32 %v221_v61, %v220_v57  ;;  %v229_v2 = vadd.f32 %v228_v62, %v227_v58  ;;  %v236_v3 = vadd.f32 %v235_v63, %v234_v59 }
  0x58   : > { %v216_v4 = vrot.slane %v215_v0, 2  ;;  %v223_v5 = vrot.slane %v222_v1, 2  ;;  %v230_v6 = vrot.slane %v229_v2, 2  ;;  %v237_v7 = vrot.slane %v236_v3, 2 }
  0x5a   : > { %v217_v8 = vadd.f32 %v216_v4, %v215_v0  ;;  %v224_v9 = vadd.f32 %v223_v5, %v222_v1  ;;  %v231_v10 = vadd.f32 %v230_v6, %v229_v2  ;;  %v238_v11 = vadd.f32 %v237_v7, %v236_v3 }
  0x5c   : > { %v218_v12 = vrot.slane %v217_v8, 1  ;;  %v225_v13 = vrot.slane %v224_v9, 1  ;;  %v232_v14 = vrot.slane %v231_v10, 1  ;;  %v239_v15 = vrot.slane %v238_v11, 1 }
  0x5e   : > { %v219_v16 = vadd.f32 %v218_v12, %v217_v8  ;;  %v226_v17 = vadd.f32 %v225_v13, %v224_v9  ;;  %v233_v18 = vadd.f32 %v232_v14, %v231_v10  ;;  %v240_v19 = vadd.f32 %v239_v15, %v238_v11 }
  0x60   : > { %v241_v20 = vmul.f32 %v219_v16, %v183_v35  ;;  %v242_v21 = vmul.f32 %v226_v17, %v183_v35  ;;  %v243_v22 = vmul.f32 %v233_v18, %v183_v35  ;;  %v244_v23 = vmul.f32 %v240_v19, %v183_v35 }
  0x62   : > { %522 = vrsqrt.f32 %v241_v20  ;;  %vm252_vm4 = vcmp.eq.f32.partialorder %v241_v20, inf  ;;  %vm254_vm5 = vcmp.eq.f32.partialorder %v241_v20, 0.0  ;;  %v255_v44 = vand.u32 2147483648, %v241_v20 }
  0x63   : > { %524 = vrsqrt.f32 %v242_v21  ;;  %vm264_vm6 = vcmp.eq.f32.partialorder %v242_v21, inf  ;;  %vm266_vm7 = vcmp.eq.f32.partialorder %v242_v21, 0.0  ;;  %v267_v51 = vand.u32 2147483648, %v242_v21 }
  0x64   : > { %526 = vrsqrt.f32 %v243_v22  ;;  %vm276_vm8 = vcmp.eq.f32.partialorder %v243_v22, inf  ;;  %vm278_vm9 = vcmp.eq.f32.partialorder %v243_v22, 0.0  ;;  %v279_v55 = vand.u32 2147483648, %v243_v22 }
  0x65   : > { %528 = vrsqrt.f32 %v244_v23  ;;  %vm288_vm10 = vcmp.eq.f32.partialorder %v244_v23, inf  ;;  %v291_v61 = vand.u32 2147483648, %v244_v23  ;;  %vm290_vm11 = vcmp.eq.f32.partialorder %v244_v23, 0.0 }
  0x68   : > { %v523_v24 = vpop.eup %522 }
  0x69   : > { %v525_v25 = vpop.eup %524  ;;  %v246_v26 = vmul.f32 %v523_v24, %v241_v20 }
  0x6a   : > { %v527_v27 = vpop.eup %526  ;;  %v258_v28 = vmul.f32 %v525_v25, %v242_v21 }
  0x6b   : > { %v529_v29 = vpop.eup %528  ;;  %v247_v30 = vmul.f32 %v523_v24, %v246_v26  ;;  %v270_v31 = vmul.f32 %v527_v27, %v243_v22 }
  0x6c   : > { %v259_v32 = vmul.f32 %v525_v25, %v258_v28  ;;  %v282_v33 = vmul.f32 %v529_v29, %v244_v23 }
  0x6d   : > { %v248_v34 = vmul.f32 0.5, %v247_v30  ;;  %v271_v36 = vmul.f32 %v527_v27, %v270_v31 }
  0x6e   : > { %v260_v37 = vmul.f32 0.5, %v259_v32  ;;  %v283_v38 = vmul.f32 %v529_v29, %v282_v33 }
  0x6f   : > { %v249_v39 = vsub.f32 1.5, %v248_v34  ;;  %v272_v35 = vmul.f32 0.5, %v271_v36 }
  0x70   : > { %v261_v40 = vsub.f32 1.5, %v260_v37  ;;  %v284_v41 = vmul.f32 0.5, %v283_v38 }
  0x71   : > { %v250_v42 = vmul.f32 %v523_v24, %v249_v39  ;;  %v273_v43 = vsub.f32 1.5, %v272_v35 }
  0x72   : > { %v262_v45 = vmul.f32 %v525_v25, %v261_v40  ;;  %v285_v46 = vsub.f32 1.5, %v284_v41 }
  0x73   : > { %v251_v47 = vmul.f32 %v250_v42, %v241_v20  ;;  %v274_v48 = vmul.f32 %v527_v27, %v273_v43 }
  0x74   : > { %v263_v49 = vmul.f32 %v262_v45, %v242_v21  ;;  %v286_v52 = vmul.f32 %v529_v29, %v285_v46 }
  0x75   : > { %v253_v53 = vsel %vm252_vm4, %v241_v20, %v251_v47  ;;  %v275_v54 = vmul.f32 %v274_v48, %v243_v22 }
  0x76   : > { %v256_v56 = vsel %vm254_vm5, %v255_v44, %v253_v53  ;;  %v265_v57 = vsel %vm264_vm6, %v242_v21, %v263_v49  ;;  %v287_v58 = vmul.f32 %v286_v52, %v244_v23 }
  0x77   : > { %v268_v59 = vsel %vm266_vm7, %v267_v51, %v265_v57  ;;  %v277_v60 = vsel %vm276_vm8, %v243_v22, %v275_v54  ;;  %v759_v62 = vadd.f32 1e-05, %v256_v56 }
  0x78   : > { %v280_v63 = vsel %vm278_vm9, %v279_v55, %v277_v60  ;;  %v289_v0 = vsel %vm288_vm10, %v244_v23, %v287_v58  ;;  %v294_v1 = vadd.f32 1e-05, %v268_v59 }
  0x79   : > { %v292_v2 = vsel %vm290_vm11, %v291_v61, %v289_v0  ;;  %v295_v3 = vadd.f32 1e-05, %v280_v63  ;;  %530 = vrcp.f32 %v759_v62  ;;  %vm302_vm12 = vweird.f32 %v759_v62 }
  0x7a   : > { %v296_v4 = vadd.f32 1e-05, %v292_v2  ;;  %532 = vrcp.f32 %v294_v1  ;;  %v306_v9 = vand.u32 2147483647, %v759_v62  ;;  %v308_v12 = vand.u32 2147483648, %v759_v62 }
  0x7b   : > { %534 = vrcp.f32 %v295_v3  ;;  %vm317_vm13 = vweird.f32 %v294_v1  ;;  %v321_v16 = vand.u32 2147483647, %v294_v1  ;;  %v323_v17 = vand.u32 2147483648, %v294_v1 }
  0x7c   : > { %536 = vrcp.f32 %v296_v4  ;;  %vm332_vm14 = vweird.f32 %v295_v3  ;;  %v336_v22 = vand.u32 2147483647, %v295_v3  ;;  %v338_v23 = vand.u32 2147483648, %v295_v3 }
  0x7d   : > { %vm322_vm6 = vcmp.eq.f32.partialorder %v321_v16, 8.507059e+37  ;;  %v324_v29 = vor.u32 1.1754944e-38, %v323_v17  ;;  %v353_v30 = vand.u32 2147483648, %v296_v4  ;;  %v351_v33 = vand.u32 2147483647, %v296_v4 }
  0x7e   : > { %vm337_vm10 = vcmp.eq.f32.partialorder %v336_v22, 8.507059e+37  ;;  %v339_v36 = vor.u32 1.1754944e-38, %v338_v23  ;;  %vm347_vm11 = vweird.f32 %v296_v4  ;;  %v309_v40 = vor.u32 1.1754944e-38, %v308_v12 }
  0x7f   : > { %v531_v5 = vpop.eup %530  ;;  %v354_v42 = vor.u32 1.1754944e-38, %v353_v30 }
  0x80   : > { %v533_v6 = vpop.eup %532  ;;  %v298_v7 = vmul.f32 %v531_v5, %v759_v62  ;;  %vm303_vm15 = vweird.f32 %v531_v5 }
  0x81   : > { %v535_v8 = vpop.eup %534  ;;  %v313_v10 = vmul.f32 %v533_v6, %v294_v1  ;;  %vm318_vm1 = vweird.f32 %v533_v6  ;;  %vm768_vm5 = vmor %vm302_vm12, %vm303_vm15  ;;  %vm352_vm15 = vcmp.eq.f32.partialorder %v351_v33, 8.507059e+37 }
  0x82   : > { %v299_v11 = vsub.f32 1.0, %v298_v7  ;;  %v328_v13 = vmul.f32 %v535_v8, %v295_v3  ;;  %v537_v14 = vpop.eup %536  ;;  %vm333_vm4 = vweird.f32 %v535_v8  ;;  %vm319_vm7 = vmor %vm317_vm13, %vm318_vm1  ;;  %vm307_vm13 = vcmp.eq.f32.partialorder %v306_v9, 8.507059e+37 }
  0x83   : > { %v314_v15 = vsub.f32 1.0, %v313_v10  ;;  %v343_v20 = vmul.f32 %v537_v14, %v296_v4  ;;  %vm348_vm8 = vweird.f32 %v537_v14  ;;  %vm334_vm9 = vmor %vm332_vm14, %vm333_vm4 }
  0x84   : > { %v300_v18 = vmul.f32 %v531_v5, %v299_v11  ;;  %v329_v19 = vsub.f32 1.0, %v328_v13  ;;  %vm349_vm12 = vmor %vm347_vm11, %vm348_vm8 }
  0x85   : > { %v315_v21 = vmul.f32 %v533_v6, %v314_v15  ;;  %v344_v26 = vsub.f32 1.0, %v343_v20 }
  0x86   : > { %v301_v24 = vadd.f32 %v531_v5, %v300_v18  ;;  %v330_v25 = vmul.f32 %v535_v8, %v329_v19 }
  0x87   : > { %v316_v28 = vadd.f32 %v533_v6, %v315_v21  ;;  %v345_v32 = vmul.f32 %v537_v14, %v344_v26 }
  0x88   : > { %v331_v31 = vadd.f32 %v535_v8, %v330_v25  ;;  %v305_v37 = vsel %vm768_vm5, %v531_v5, %v301_v24 }
  0x89   : > { %v320_v34 = vsel %vm319_vm7, %v533_v6, %v316_v28  ;;  %v346_v35 = vadd.f32 %v537_v14, %v345_v32  ;;  %v310_v46 = vsel %vm307_vm13, %v309_v40, %v305_v37 }
  0x8a   : > { %v325_v38 = vsel %vm322_vm6, %v324_v29, %v320_v34  ;;  %v335_v39 = vsel %vm334_vm9, %v535_v8, %v331_v31 }
  0x8b   : > { %v340_v41 = vsel %vm337_vm10, %v339_v36, %v335_v39  ;;  %v361_v43 = vrot.slane %v325_v38, 6  ;;  %v350_v44 = vsel %vm349_vm12, %v537_v14, %v346_v35 }
  0x8c   : > { %v362_v45 = vrot.slane %v340_v41, 4  ;;  %v355_v47 = vsel %vm352_vm15, %v354_v42, %v350_v44 }
  0x8d   : > { %v363_v48 = vrot.slane %v355_v47, 2  ;;  %v364_v49 = vsel %vm148_vm0, %v310_v46, %v361_v43 }
  0x8f   : > { %v365_v51 = vsel %vm196_vm2, %v362_v45, %v363_v48 }
  0x90   : > { %v366_v52 = vsel %vm198_vm3, %v364_v49, %v365_v51 }
  0x91   : > { %v368_v53 = vmul.f32 %v366_v52, %v750_v50 }
  0x93   : > { %369 = vst [vmem:[%s134_s25] sm:$0xff] %v368_v53 }
  0x94   : > { %595 = shalt.err (!%p592_p4)
}
  0x95   : > { %475 = dma.vmem_to_hbm [thread:$0]  (%p697_p11), %s385_s26, 128, %s387_s27, %s371_s28  }
  0x96 PF: > { %s398_s13 = sand.u32 1, %s622_s6   ;;  %p824_p7 = scmp.ge.s32.totalorder %s634_s9, 2 }
  0x97   : > { %s399_s14 = scalar_lea.sflag [#allocation4], %s398_s13 }
  0x98   : > { %p482_p5 = pnand %p824_p7, %p701_p12 }
  0x9a   : > { %p483_p8 = pneg %p482_p5 }
  0x9c   : > { %617 = dma.done.wait (%p483_p8), %s399_s14, 128  }
  0x9d   : > { %619 = vsyncadd (%p483_p8), %s399_s14, 4294967168  ;;  %p14_p10 = scmp.ge.s32.totalorder %s672_s12, 4   ;;  %s825_s6 = smov %s626_s7 }
  0x9e   : > { %s826_s7 = smov %s630_s8  ;;  %s827_s8 = smov %s684_s15 }
  0x9f   : > { %s828_s9 = smov %s672_s12  ;;  %16 = sbr.rel (!%p14_p10) target bundleno = 5 (0x5), region = 69 }
  0xa4   :  { %405 = vsyncpa [#allocation3], 1 }
  0xa5   :  { %407 = vsyncpa [#allocation3 + $0x1], 1 }
  0xa6   :  { %408 = vsyncpa [#allocation4], 1 }
  0xa7   :  { %410 = vsyncpa [#allocation4 + $0x1], 1 }

</bundles_post_ra>
